<compile_context>
chip_gen: v6e
topology: v6e:2x2x1
jax: 0.10.0
libtpu: 0.0.40
codegen_flags: <defaults>
</compile_context>

<pallas_src>
import jax
import jax.numpy as jnp
from jax import lax
from jax.experimental import pallas as pl
from jax.experimental.pallas import tpu as pltpu

EPS = 1e-12  # matches torch.nn.functional.normalize default eps
LANE = 128


def _l2norm_kernel(x_ref, o_ref):
    # Block: (C, TILE_HW) for one batch element / one spatial tile.
    xf = x_ref[...].astype(jnp.float32)
    # Sum of squares over the channel (sublane) axis, per spatial location.
    sq = jnp.sum(xf * xf, axis=0, keepdims=True)            # (1, TILE_HW) f32
    # 1 / max(||x||, eps)  ==  rsqrt(max(sum_sq, eps^2))  (sum_sq >= 0)
    scale = lax.rsqrt(jnp.maximum(sq, EPS * EPS))            # EUP rsqrt on reduced row
    o_ref[...] = (xf * scale).astype(o_ref.dtype)


def _round_up(x, m):
    return ((x + m - 1) // m) * m


def _sublane(dtype_bytes):
    # Sublane tile per dtype width (f32: 8, bf16/f16: 16, int8/fp8: 32).
    return {4: 8, 2: 16, 1: 32}.get(dtype_bytes, 8)


def _vmem_budget():
    """(block budget, scoped VMEM limit) in bytes, generation aware."""
    try:
        cap = pltpu.get_tpu_info().vmem_capacity_bytes
    except Exception:  # fall back to the v5e/v6e physical size
        cap = 128 * 1024 * 1024
    budget = min(24 * 1024 * 1024, cap // 3)          # in+out double buffers + temps
    limit = min(cap // 2, budget + 8 * 1024 * 1024)   # scoped limit with headroom
    return budget, limit


def _choose_tile_hw(C, hw, dtype_bytes, budget_bytes, batch):
    """Largest lane-aligned spatial tile whose pipelined footprint fits the budget."""
    if hw <= LANE:
        return hw  # full-extent last dim is always a legal block shape
    c_pad = _round_up(C, _sublane(dtype_bytes))  # VMEM blocks are sublane padded
    c_f32 = _round_up(C, 8)                      # f32 temps (xf, product) sublane pad
    # 2 buffers each for the input and output block + live f32 temporaries.
    per_lane = 4 * c_pad * dtype_bytes + 2 * c_f32 * 4
    tile = budget_bytes // max(per_lane, 1)
    tile = max(LANE, (tile // LANE) * LANE)
    tile = min(tile, _round_up(hw, LANE))
    # v7x megacore: keep at least 2 grid blocks so both TensorCores get work.
    if batch * pl.cdiv(hw, tile) < 2 and tile > LANE:
        tile = max(LANE, _round_up(pl.cdiv(hw, 2), LANE))
    return tile


def l2_normalize_nchw(x):
    """L2-normalize along channel dim (dim=1) of an NCHW tensor."""
    B, C, H, W = x.shape
    hw = H * W
    dtype_bytes = jnp.dtype(x.dtype).itemsize

    budget, vmem_limit = _vmem_budget()
    tile_hw = _choose_tile_hw(C, hw, dtype_bytes, budget, B)
    n_spatial_tiles = pl.cdiv(hw, tile_hw)  # partial last block handled by Pallas

    x_flat = x.reshape(B, C, hw)

    out_flat = pl.pallas_call(
        _l2norm_kernel,
        out_shape=jax.ShapeDtypeStruct((B, C, hw), x.dtype),
        grid_spec=pltpu.PrefetchScalarGridSpec(
            num_scalar_prefetch=0,
            grid=(B, n_spatial_tiles),
            in_specs=[pl.BlockSpec((pl.Squeezed(), C, tile_hw),
                                   lambda b, s: (b, 0, s))],
            out_specs=pl.BlockSpec((pl.Squeezed(), C, tile_hw),
                                   lambda b, s: (b, 0, s)),
        ),
        compiler_params=pltpu.CompilerParams(
            dimension_semantics=("parallel", "parallel"),
            vmem_limit_bytes=vmem_limit,
        ),
        cost_estimate=pl.CostEstimate(
            flops=3 * B * C * hw,
            transcendentals=B * hw,
            bytes_accessed=2 * B * C * hw * dtype_bytes,
        ),
    )(x_flat)

    return out_flat.reshape(B, C, H, W)


def _reference(x):
    norm = jnp.sqrt(jnp.sum(x.astype(jnp.float32) ** 2, axis=1, keepdims=True))
    return (x.astype(jnp.float32) / jnp.maximum(norm, EPS)).astype(x.dtype)


if __name__ == "__main__":
    key = jax.random.PRNGKey(0)

    # Main test shape (matches the module's NCHW usage).
    x = jax.random.normal(key, (2, 4, 16, 16), dtype=jnp.float32)
    out = jax.block_until_ready(l2_normalize_nchw(x))
    ref = _reference(x)
    assert out.shape == x.shape
    assert jnp.allclose(out, ref, atol=1e-5, rtol=1e-5)

    # Ragged spatial extent exercises the partial-last-block (masked) path.
    key2, _ = jax.random.split(key)
    x2 = jax.random.normal(key2, (2, 4, 15, 15), dtype=jnp.float32)
    out2 = jax.block_until_ready(l2_normalize_nchw(x2))
    ref2 = _reference(x2)
    assert out2.shape == x2.shape
    assert jnp.allclose(out2, ref2, atol=1e-5, rtol=1e-5)

    print("KERNEL_OK")
</pallas_src>

<mosaic_0001>
module attributes {stable_mosaic.version = 11 : i64} {
  func.func @_l2norm_kernel(%arg0: i32, %arg1: i32, %arg2: memref<1x4x256xf32, #tpu.memory_space<vmem>>, %arg3: memref<1x4x256xf32, #tpu.memory_space<vmem>>) attributes {dimension_semantics = [#tpu.dimension_semantics<parallel>, #tpu.dimension_semantics<parallel>], iteration_bounds = array<i64: 2, 1>, scalar_prefetch = 0 : i64, scratch_operands = 0 : i64, tpu.core_type = #tpu.core_type<tc>, window_params = [{transform_indices = @transform_0, window_bounds = array<i64: 1, 4, 256>}, {transform_indices = @transform_1, window_bounds = array<i64: 1, 4, 256>}]} {
    %c0 = arith.constant 0 : index
    %c0_0 = arith.constant 0 : index
    %c0_1 = arith.constant 0 : index
    %0 = vector.load %arg2[%c0, %c0_0, %c0_1] : memref<1x4x256xf32, #tpu.memory_space<vmem>>, vector<1x4x256xf32>
    %1 = vector.shape_cast %0 : vector<1x4x256xf32> to vector<4x256xf32>
    %2 = arith.mulf %1, %1 : vector<4x256xf32>
    %cst = arith.constant dense<0.000000e+00> : vector<256xf32>
    %3 = vector.multi_reduction <add>, %2, %cst [0] : vector<4x256xf32> to vector<256xf32>
    %4 = vector.shape_cast %3 : vector<256xf32> to vector<1x256xf32>
    %cst_2 = arith.constant 1.000000e-24 : f32
    %5 = vector.broadcast %cst_2 : f32 to vector<1x256xf32>
    %6 = arith.maximumf %4, %5 : vector<1x256xf32>
    %7 = math.rsqrt %6 : vector<1x256xf32>
    %8 = vector.broadcast %7 : vector<1x256xf32> to vector<4x256xf32>
    %9 = arith.mulf %1, %8 : vector<4x256xf32>
    %c0_3 = arith.constant 0 : index
    %c0_4 = arith.constant 0 : index
    %c0_5 = arith.constant 0 : index
    %10 = vector.load %arg3[%c0_3, %c0_4, %c0_5] : memref<1x4x256xf32, #tpu.memory_space<vmem>>, vector<1x4x256xf32>
    %11 = vector.shape_cast %10 : vector<1x4x256xf32> to vector<4x256xf32>
    %12 = vector.shape_cast %9 : vector<4x256xf32> to vector<1x4x256xf32>
    tpu.vector_store %arg3[%c0_3, %c0_4, %c0_5], %12 {strides = array<i32>} : memref<1x4x256xf32, #tpu.memory_space<vmem>>, vector<1x4x256xf32>,
    return
  }
  func.func @transform_0(%arg0: i32, %arg1: i32) -> (i32, i32, i32) {
    %c0_i32 = arith.constant 0 : i32
    %c0_i32_0 = arith.constant 0 : i32
    return %arg0, %c0_i32, %arg1 : i32, i32, i32
  }
  func.func @transform_1(%arg0: i32, %arg1: i32) -> (i32, i32, i32) {
    %c0_i32 = arith.constant 0 : i32
    %c0_i32_0 = arith.constant 0 : i32
    return %arg0, %c0_i32, %arg1 : i32, i32, i32
  }
}

</mosaic_0001>

<bundles_post_ra>
// kernel: tpu_custom_call.1
= control target key start
LH: loop header
LB: loop body
LE: loop exit
PB: predicated region body
PF: predicated region fallthrough
CT: control target
= control target key end

     0   :  { %6 = vsyncpa [#allocation3], 0  ;;  %s623_s0 = inlined_call_operand.hbm [shape: f32[2,4,256], index: 0, kind: input, shape index: {}]   ;;  %s624_s1 = inlined_call_operand.hbm [shape: f32[2,4,256], index: 1, kind: output, shape index: {}]  }
   0x1   :  { %8 = vsyncpa [#allocation3 + $0x1], 0 }
   0x2   :  { %9 = vsyncpa [#allocation4], 0 }
   0x3   :  { %11 = vsyncpa [#allocation4 + $0x1], 0  ;;  %s489_s6 = smov 0   ;;  %s491_s7 = smov 0  }
   0x4   :  { %s493_s8 = smov 0   ;;  %s495_s9 = smov 0  }
   0x5   :  { %s497_s10 = smov 0   ;;  %s499_s11 = smov 0  }
   0x6 LB: > { %s284_s12 = sadd.s32 4294967295, %s475_s11   ;;  %s285_s13 = sadd.s32 4294967294, %s475_s11   ;;  %s475_s11 = sphi %s499_s11, %s17_s11   ;;  %s471_s10 = sphi %s497_s10, %s636_s10   ;;  %s467_s9 = sphi %s495_s9, %s635_s9   ;;  %s463_s8 = sphi %s493_s8, %s634_s8   ;;  %s459_s7 = sphi %s491_s7, %s633_s7   ;;  %s455_s6 = sphi %s489_s6, %s632_s6  }
   0x7   : > { %s29_s14 = sadd.s32 1, %s471_s10  ;;  %s38_s15 = sadd.s32 1, %s463_s8 }
   0x8   : > { %p31_p0 = scmp.ge.s32.totalorder %s29_s14, 2  ;;  %p45_p1 = scmp.ne.s32.totalorder %s463_s8, %s459_s7 }
   0x9   : > { %p46_p2 = scmp.eq.s32.totalorder %s475_s11, 0  ;;  %p51_p3 = scmp.ne.s32.totalorder %s459_s7, %s455_s6 }
   0xa   : > { %s638_s14 = smov (%p31_p0, %s29_s14), 0  ;;  %p52_p5 = scmp.eq.s32.totalorder %s284_s12, 0 }
   0xb   : > { %p530_p4 = por %p46_p2, %p45_p1  ;;  %s33_s17 = ssub.s32 %s471_s10, %s638_s14 }
   0xc   : > { %p77_p6 = scmp.eq.s32.totalorder %s284_s12, 1  ;;  %p36_p7 = scmp.eq.s32.totalorder %s33_s17, 0 }
   0xd   : > { %p536_p8 = por %p52_p5, %p51_p3  ;;  %p83_p10 = scmp.eq.s32.totalorder %s285_s13, 1 }
   0xe   : > { %p540_p9 = por %p77_p6, %p45_p1  ;;  %p313_p13 = scmp.lt.s32.totalorder %s475_s11, 2 }
   0xf   : > { %s545_s20 = scalar_select %p36_p7, %s463_s8, %s38_s15  }
  0x10   : > { %p547_p11 = por %p83_p10, %p51_p3  ;;  %s103_s22 = sand.u32 1, %s463_s8  }
  0x11   : > { %s288_s23 = sshll.u32 %s103_s22, 3  ;;  %s299_s24 = sshll.u32 %s471_s10, 7 }
  0x12   : > { %s628_s21 = scalar_select %p547_p11, 1, 0 }
  0x13   : > { %s115_s27 = scalar_lea.hbm %s623_s0, %s299_s24  ;;  %s107_s28 = scalar_lea.vmem [#allocation2], %s288_s23 }
  0x14   : > { %s117_s29 = sshll.u32 %s107_s28, 4  ;;  %p560_p0 = pnand %p313_p13, %p530_p4  ;;  %s118_s29 = int_to_ptr.vmem [resolvable:$true] %s117_s29 }
  0x15   : > { %p291_p1 = scmp.ge.s32.totalorder %s475_s11, 1  ;;  %p122_p2 = scmp.lt.s32.totalorder %s475_s11, 3 }
  0x16   : > { %s104_s2 = scalar_lea.sflag [#allocation3], %s103_s22  ;;  %p369_p3 = pneg %p560_p0 }
  0x17   : > { %s380_s3 = scalar_lea.vmem %s118_s29, 128  ;;  %s477_s4 = smov [#allocation2]  }
  0x18   : > { %p381_p5 = scmp.ne.s32.totalorder %s118_s29, %s380_s3  ;;  %s385_s5 = sshll.u32 %s477_s4, 4  ;;  %s386_s5 = int_to_ptr.vmem [resolvable:$false] %s385_s5 }
  0x19   : > { %s387_s12 = scalar_lea.vmem %s386_s5, 256  ;;  %p388_p10 = scmp.lt.s32.totalorder %s118_s29, %s386_s5 }
  0x1a   : > { %p383_p6 = pnand %p381_p5, %p369_p3  ;;  %p389_p12 = scmp.lt.s32.totalorder %s387_s12, %s380_s3 }
  0x1c   : > { %p384_p7 = pneg %p383_p6  ;;  %p390_p4 = por %p389_p12, %p388_p10 }
  0x1e   : > { %p391_p13 = pnand %p390_p4, %p384_p7 }
  0x20   : > { %394 = shalt.err (!%p391_p13)
}
  0x21   : > { %308 = dma.hbm_to_vmem [thread:$0]  (!%p560_p0), %s115_s27, 128, %s118_s29, %s104_s2  }
  0x22   : > { %p123_p11 = pnand %p291_p1, %p122_p2 }
  0x23   : > { %s575_s13 = sand.u32 (!%p123_p11), 1, %s459_s7  }
  0x24   : > { %126 = sbr.rel (%p123_p11) target bundleno = 93 (0x5d), region = 24  ;;  %s292_s15 = sshll.u32 (!%p123_p11), %s575_s13, 3 }
  0x25   : > { %s129_s16 = scalar_lea.sflag (!%p123_p11), [#allocation3], %s575_s13  ;;  %s132_s17 = scalar_lea.vmem (!%p123_p11), [#allocation2], %s292_s15 }
  0x29   : > { %446 = dma.done.wait (%p536_p8), %s129_s16, 128  }
  0x2a   : > { %448 = vsyncadd (%p536_p8), %s129_s16, 4294967168  ;;  %v153_v0 = vld [vmem:[%s132_s17] sm:$0xff]  ;;  %vm158_vm0 = vcmask 1043456   ;;  %s150_s18 = scalar_lea.vmem [#allocation5], %s292_s15  ;;  %s300_s23 = sshll.u32 %s467_s9, 7 }
  0x2b   : > { %v154_v1 = vmul.f32 %v153_v0, %v153_v0  ;;  %s200_s22 = sshll.u32 %s150_s18, 4  ;;  %s198_s26 = scalar_lea.hbm %s624_s1, %s300_s23  ;;  %s201_s22 = int_to_ptr.vmem [resolvable:$true] %s200_s22 }
  0x2c   : > { %s184_s27 = scalar_lea.sflag [#allocation4], %s575_s13  ;;  %s395_s28 = scalar_lea.vmem %s201_s22, 128 }
  0x2d   : > { %v156_v2 = vcombine.high %v154_v1, %v154_v1  ;;  %v159_v3 = vsel %vm158_vm0, %v154_v1, 0.0  ;;  %p396_p8 = scmp.ne.s32.totalorder %s201_s22, %s395_s28  ;;  %s478_s29 = smov [#allocation5]  }
  0x2e   : > { %v160_v4 = vrot.slane %v159_v3, 4  ;;  %s399_s30 = sshll.u32 %s478_s29, 4  ;;  %s400_s30 = int_to_ptr.vmem [resolvable:$false] %s399_s30 }
  0x2f   : > { %v166_v5 = vsel %vm158_vm0, %v156_v2, 0.0  ;;  %p397_p11 = pnand %p396_p8, %p540_p9  ;;  %s401_s2 = scalar_lea.vmem %s400_s30, 256 }
  0x30   : > { %v161_v6 = vadd.f32 %v160_v4, %v159_v3  ;;  %v167_v7 = vrot.slane %v166_v5, 4  ;;  %p402_p0 = scmp.lt.s32.totalorder %s201_s22, %s400_s30  ;;  %p403_p1 = scmp.lt.s32.totalorder %s401_s2, %s395_s28 }
  0x31   : > { %p398_p12 = pneg %p397_p11 }
  0x32   : > { %v162_v8 = vrot.slane %v161_v6, 2  ;;  %v168_v9 = vadd.f32 %v167_v7, %v166_v5  ;;  %p404_p2 = por %p403_p1, %p402_p0 }
  0x34   : > { %v163_v10 = vadd.f32 %v162_v8, %v161_v6  ;;  %v169_v11 = vrot.slane %v168_v9, 2  ;;  %p405_p3 = pnand %p404_p2, %p398_p12 }
  0x36   : > { %v164_v12 = vrot.slane %v163_v10, 1  ;;  %v170_v13 = vadd.f32 %v169_v11, %v168_v9 }
  0x38   : > { %v165_v14 = vadd.f32 %v164_v12, %v163_v10  ;;  %v171_v15 = vrot.slane %v170_v13, 1 }
  0x3a   : > { %v172_v16 = vadd.f32 %v171_v15, %v170_v13  ;;  %v173_v17 = vmax.f32 %v165_v14, 1e-24 }
  0x3c   : > { %v174_v18 = vmax.f32 %v172_v16, 1e-24  ;;  %363 = vrsqrt.f32 %v173_v17 }
  0x3e   : > { %365 = vrsqrt.f32 %v174_v18 }
  0x49   : > { %v364_v19 = vpop.eup %363 }
  0x4b   : > { %v366_v20 = vpop.eup %365 }
  0x4c   : > { %v179_v21 = vcombine.low %v364_v19, %v366_v20 }
  0x4e   : > { %v181_v22 = vmul.f32 %v179_v21, %v153_v0 }
  0x50   : > { %182 = vst [vmem:[%s150_s18] sm:$0xff] %v181_v22 }
  0x51   : > { %408 = shalt.err (!%p405_p3)
}
  0x52   : > { %s409_s9 = scalar_lea.hbm %s198_s26, 128  ;;  %s413_s5 = scalar_lea.hbm %s624_s1, 256 }
  0x53   : > { %p410_p5 = scmp.ne.s32.totalorder %s198_s26, %s409_s9  ;;  %p414_p10 = scmp.lt.s32.totalorder %s198_s26, %s624_s1 }
  0x54   : > { %p415_p4 = scmp.lt.s32.totalorder %s413_s5, %s409_s9 }
  0x55   : > { %p411_p6 = pnand %p410_p5, %p540_p9 }
  0x56   : > { %p416_p13 = por %p415_p4, %p414_p10 }
  0x57   : > { %p412_p7 = pneg %p411_p6 }
  0x59   : > { %p417_p8 = pnand %p416_p13, %p412_p7 }
  0x5b   : > { %420 = shalt.err (!%p417_p8)
}
  0x5c   : > { %303 = dma.vmem_to_hbm [thread:$0]  (%p540_p9), %s201_s22, 128, %s198_s26, %s184_s27  }
  0x5d PF: > { %s212_s15 = sand.u32 1, %s455_s6   ;;  %p630_p11 = scmp.ne.s32.totalorder %s628_s21, 0 }
  0x5e   : > { %p631_p12 = scmp.ge.s32.totalorder %s475_s11, 2  ;;  %s213_s16 = scalar_lea.sflag [#allocation4], %s212_s15 }
  0x60   : > { %p310_p0 = pnand %p631_p12, %p630_p11 }
  0x62   : > { %p311_p1 = pneg %p310_p0 }
  0x64   : > { %450 = dma.done.wait (%p311_p1), %s213_s16, 128  }
  0x65   : > { %452 = vsyncadd (%p311_p1), %s213_s16, 4294967168  ;;  %s17_s11 = sadd.s32 1, %s475_s11   ;;  %s632_s6 = smov %s459_s7 }
  0x66   : > { %p14_p2 = scmp.ge.s32.totalorder %s17_s11, 4   ;;  %s633_s7 = smov %s463_s8 }
  0x67   : > { %s634_s8 = smov %s545_s20  ;;  %s635_s9 = smov %s471_s10 }
  0x68   : > { %s636_s10 = smov %s638_s14  ;;  %16 = sbr.rel (!%p14_p2) target bundleno = 6 (0x6), region = 69 }
  0x6d   :  { %218 = vsyncpa [#allocation3], 1 }
  0x6e   :  { %220 = vsyncpa [#allocation3 + $0x1], 1 }
  0x6f   :  { %221 = vsyncpa [#allocation4], 1 }
  0x70   :  { %223 = vsyncpa [#allocation4 + $0x1], 1 }

</bundles_post_ra>
